<compile_context>
chip_gen: v7x
topology: tpu7x:2x2x1
jax: 0.10.0
libtpu: 0.0.40
codegen_flags: <defaults>
</compile_context>

<pallas_src>
import functools

import jax
import jax.numpy as jnp
from jax.experimental import pallas as pl
from jax.experimental.pallas import tpu as pltpu


def _pad_to(n, m=128):
    """Round n up to a multiple of m (lane width)."""
    return ((n + m - 1) // m) * m


def make_mlp_kernel(h1p, h2p, h3p, cp):
    """Build the kernel with static (padded) hidden widths baked in."""
    o2 = h1p
    o3 = h1p + h2p
    o4 = h1p + h2p + h3p

    def mlp_kernel(x_ref, w1_ref, w2_ref, w3_ref, w4_ref, b_ref, o_ref):
        # x arrives as f32 [TB, d_in] straight from HBM; single in-register
        # cast to bf16 for the MXU (no wrapper-side pad/cast pass).
        x = x_ref[...].astype(jnp.bfloat16)

        # fc1 + ReLU  (f32 MXU accumulate, f32 epilogue -- safe on all chips;
        # bf16 re-cast only to feed the next MXU op).
        h = jnp.dot(x, w1_ref[...], preferred_element_type=jnp.float32)
        h = jnp.maximum(h + b_ref[:, 0:h1p], 0.0).astype(jnp.bfloat16)

        # fc2 + ReLU
        h = jnp.dot(h, w2_ref[...], preferred_element_type=jnp.float32)
        h = jnp.maximum(h + b_ref[:, o2:o2 + h2p], 0.0).astype(jnp.bfloat16)

        # fc3 + ReLU
        h = jnp.dot(h, w3_ref[...], preferred_element_type=jnp.float32)
        h = jnp.maximum(h + b_ref[:, o3:o3 + h3p], 0.0).astype(jnp.bfloat16)

        # fc4 + Sigmoid (lax.logistic -> EUP; robust for large |pre-act|).
        h = jnp.dot(h, w4_ref[...], preferred_element_type=jnp.float32)
        h = h + b_ref[:, o4:o4 + cp]
        o_ref[...] = jax.nn.sigmoid(h).astype(o_ref.dtype)

    return mlp_kernel


@functools.partial(jax.jit, static_argnames=("classes", "tb"))
def simple_mlp_forward(x, params, *, classes, tb=128):
    """x: [B, shape] f32.  params: padded bf16 weights [in_p, out_p] + fused bias."""
    B, d_in = x.shape
    w1, w2, w3, w4 = params["w1"], params["w2"], params["w3"], params["w4"]
    bias = params["bias"]
    h1p, h2p, h3p, cp = w1.shape[1], w2.shape[1], w3.shape[1], w4.shape[1]

    # One grid step per TensorCore is ideal: tb == B on single-TC v5e/v6e,
    # tb == B//2 on dual-TC v7x (grid axis is "parallel").
    tb = min(tb, B)
    n_tiles = pl.cdiv(B, tb)
    Bp = n_tiles * tb
    if Bp != B:
        # Only pad the batch axis if B isn't a tile multiple (kept f32, no
        # feature padding / dtype cast in the wrapper).
        x = jnp.pad(x, ((0, Bp - B), (0, 0)))

    # Weights / fused bias: constant index_map (VMEM-resident, loaded once)
    # and single-buffered -- only x / out need pipelining.
    def resident(a):
        return pl.BlockSpec(a.shape, lambda i: (0, 0),
                            pipeline_mode=pl.Buffered(1))

    out = pl.pallas_call(
        make_mlp_kernel(h1p, h2p, h3p, cp),
        out_shape=jax.ShapeDtypeStruct((Bp, cp), jnp.bfloat16),
        grid=(n_tiles,),
        in_specs=[
            pl.BlockSpec((tb, d_in), lambda i: (i, 0)),      # x: batch-tiled, f32
            resident(w1), resident(w2), resident(w3), resident(w4),
            resident(bias),                                   # fused biases [1, 640]
        ],
        out_specs=pl.BlockSpec((tb, cp), lambda i: (i, 0)),   # lane-dense bf16
        compiler_params=pltpu.CompilerParams(
            dimension_semantics=("parallel",)),               # v7x: 2 TCs split batch
    )(x, w1, w2, w3, w4, bias)

    return out[:B, :classes].astype(jnp.float32)


def init_params(key, shape, classes):
    """PyTorch nn.Linear-style init (U(-1/sqrt(fan_in), +1/sqrt(fan_in))).

    Returns (raw_f32, padded_bf16): raw unpadded params for the reference
    check, plus lane-padded bf16 weights (fc1 keeps its unpadded K = shape)
    and a single fused f32 bias row for the kernel.  Weights are [in, out] so
    the kernel computes x @ W + b.
    """
    dims = [(shape, 200), (200, 100), (100, 50), (50, classes)]
    raw = {}
    for i, (fi, fo) in enumerate(dims, start=1):
        key, kw, kb = jax.random.split(key, 3)
        bound = 1.0 / (fi ** 0.5)
        raw[f"w{i}"] = jax.random.uniform(kw, (fi, fo), jnp.float32, -bound, bound)
        raw[f"b{i}"] = jax.random.uniform(kb, (fo,), jnp.float32, -bound, bound)

    padded = {}
    bias_chunks = []
    for i, (fi, fo) in enumerate(dims, start=1):
        fip = fi if i == 1 else _pad_to(fi)   # fc1: unpadded K (input feature dim)
        fop = _pad_to(fo)
        w = jnp.zeros((fip, fop), jnp.float32).at[:fi, :fo].set(raw[f"w{i}"])
        padded[f"w{i}"] = w.astype(jnp.bfloat16)
        bias_chunks.append(
            jnp.zeros((fop,), jnp.float32).at[:fo].set(raw[f"b{i}"]))
    padded["bias"] = jnp.concatenate(bias_chunks)[None, :]   # [1, 256+128+128+128]
    return raw, padded


if __name__ == "__main__":
    key = jax.random.PRNGKey(0)
    key, kx = jax.random.split(key)

    B = 256        # small demo batch; exercises a 2-step parallel grid
    SHAPE = 32     # input feature dim ("shape" argument of SimpleMLP)
    CLASSES = 10   # output classes
    TB = 128       # 2 parallel steps (one per TC on v7x); negligible overhead on v5e/v6e

    x = jax.random.normal(kx, (B, SHAPE), jnp.float32)
    raw, padded = init_params(key, SHAPE, CLASSES)

    out = simple_mlp_forward(x, padded, classes=CLASSES, tb=TB)
    out = jax.block_until_ready(out)

    # Pure-JAX f32 reference (kernel uses bf16 weights/activations + bf16
    # output -> loose tolerance).
    h = x
    for i in range(1, 4):
        h = jnp.maximum(h @ raw[f"w{i}"] + raw[f"b{i}"], 0.0)
    ref = jax.nn.sigmoid(h @ raw["w4"] + raw["b4"])

    assert out.shape == (B, CLASSES)
    assert jnp.allclose(out, ref, atol=2e-2, rtol=2e-2), \
        float(jnp.max(jnp.abs(out - ref)))

    print("KERNEL_OK")
</pallas_src>

<mosaic_0001>
module attributes {stable_mosaic.version = 11 : i64} {
  func.func @mlp_kernel(%arg0: i32, %arg1: memref<128x32xf32, #tpu.memory_space<vmem>>, %arg2: memref<32x256xbf16, #tpu.memory_space<vmem>>, %arg3: memref<256x128xbf16, #tpu.memory_space<vmem>>, %arg4: memref<128x128xbf16, #tpu.memory_space<vmem>>, %arg5: memref<128x128xbf16, #tpu.memory_space<vmem>>, %arg6: memref<1x640xf32, #tpu.memory_space<vmem>>, %arg7: memref<128x128xbf16, #tpu.memory_space<vmem>>) attributes {dimension_semantics = [#tpu.dimension_semantics<parallel>], iteration_bounds = array<i64: 2>, scalar_prefetch = 0 : i64, scratch_operands = 0 : i64, tpu.core_type = #tpu.core_type<tc>, window_params = [{transform_indices = @transform_0, window_bounds = array<i64: 128, 32>}, {pipeline_mode = #tpu.pipeline_mode<synchronous>, transform_indices = @transform_1, window_bounds = array<i64: 32, 256>}, {pipeline_mode = #tpu.pipeline_mode<synchronous>, transform_indices = @transform_2, window_bounds = array<i64: 256, 128>}, {pipeline_mode = #tpu.pipeline_mode<synchronous>, transform_indices = @transform_3, window_bounds = array<i64: 128, 128>}, {pipeline_mode = #tpu.pipeline_mode<synchronous>, transform_indices = @transform_4, window_bounds = array<i64: 128, 128>}, {pipeline_mode = #tpu.pipeline_mode<synchronous>, transform_indices = @transform_5, window_bounds = array<i64: 1, 640>}, {transform_indices = @transform_6, window_bounds = array<i64: 128, 128>}]} {
    %c0 = arith.constant 0 : index
    %c0_0 = arith.constant 0 : index
    %0 = vector.load %arg1[%c0, %c0_0] : memref<128x32xf32, #tpu.memory_space<vmem>>, vector<128x32xf32>
    %1 = arith.truncf %0 : vector<128x32xf32> to vector<128x32xbf16>
    %c0_1 = arith.constant 0 : index
    %c0_2 = arith.constant 0 : index
    %2 = vector.load %arg2[%c0_1, %c0_2] : memref<32x256xbf16, #tpu.memory_space<vmem>>, vector<32x256xbf16>
    %cst = arith.constant dense<0.000000e+00> : vector<128x256xf32>
    %3 = tpu.matmul %1, %2, %cst {dimension_numbers = #tpu.dot_dimension_numbers<[1], [0], [0], [1], [0, 0, 1, 1], [], []>} : vector<128x32xbf16>, vector<32x256xbf16>, vector<128x256xf32> -> vector<128x256xf32>
    %c0_3 = arith.constant 0 : index
    %c0_4 = arith.constant 0 : index
    %4 = vector.load %arg6[%c0_3, %c0_4] : memref<1x640xf32, #tpu.memory_space<vmem>>, vector<1x256xf32>
    %5 = vector.broadcast %4 : vector<1x256xf32> to vector<128x256xf32>
    %6 = arith.addf %3, %5 : vector<128x256xf32>
    %cst_5 = arith.constant 0.000000e+00 : f32
    %7 = vector.broadcast %cst_5 : f32 to vector<128x256xf32>
    %8 = arith.maximumf %6, %7 : vector<128x256xf32>
    %9 = arith.truncf %8 : vector<128x256xf32> to vector<128x256xbf16>
    %c0_6 = arith.constant 0 : index
    %c0_7 = arith.constant 0 : index
    %10 = vector.load %arg3[%c0_6, %c0_7] : memref<256x128xbf16, #tpu.memory_space<vmem>>, vector<256x128xbf16>
    %cst_8 = arith.constant dense<0.000000e+00> : vector<128x128xf32>
    %11 = tpu.matmul %9, %10, %cst_8 {dimension_numbers = #tpu.dot_dimension_numbers<[1], [0], [0], [1], [0, 0, 1, 1], [], []>} : vector<128x256xbf16>, vector<256x128xbf16>, vector<128x128xf32> -> vector<128x128xf32>
    %c0_9 = arith.constant 0 : index
    %c256 = arith.constant 256 : index
    %12 = vector.load %arg6[%c0_9, %c256] : memref<1x640xf32, #tpu.memory_space<vmem>>, vector<1x128xf32>
    %13 = vector.broadcast %12 : vector<1x128xf32> to vector<128x128xf32>
    %14 = arith.addf %11, %13 : vector<128x128xf32>
    %cst_10 = arith.constant 0.000000e+00 : f32
    %15 = vector.broadcast %cst_10 : f32 to vector<128x128xf32>
    %16 = arith.maximumf %14, %15 : vector<128x128xf32>
    %17 = arith.truncf %16 : vector<128x128xf32> to vector<128x128xbf16>
    %c0_11 = arith.constant 0 : index
    %c0_12 = arith.constant 0 : index
    %18 = vector.load %arg4[%c0_11, %c0_12] : memref<128x128xbf16, #tpu.memory_space<vmem>>, vector<128x128xbf16>
    %cst_13 = arith.constant dense<0.000000e+00> : vector<128x128xf32>
    %19 = tpu.matmul %17, %18, %cst_13 {dimension_numbers = #tpu.dot_dimension_numbers<[1], [0], [0], [1], [0, 0, 1, 1], [], []>} : vector<128x128xbf16>, vector<128x128xbf16>, vector<128x128xf32> -> vector<128x128xf32>
    %c0_14 = arith.constant 0 : index
    %c384 = arith.constant 384 : index
    %20 = vector.load %arg6[%c0_14, %c384] : memref<1x640xf32, #tpu.memory_space<vmem>>, vector<1x128xf32>
    %21 = vector.broadcast %20 : vector<1x128xf32> to vector<128x128xf32>
    %22 = arith.addf %19, %21 : vector<128x128xf32>
    %cst_15 = arith.constant 0.000000e+00 : f32
    %23 = vector.broadcast %cst_15 : f32 to vector<128x128xf32>
    %24 = arith.maximumf %22, %23 : vector<128x128xf32>
    %25 = arith.truncf %24 : vector<128x128xf32> to vector<128x128xbf16>
    %c0_16 = arith.constant 0 : index
    %c0_17 = arith.constant 0 : index
    %26 = vector.load %arg5[%c0_16, %c0_17] : memref<128x128xbf16, #tpu.memory_space<vmem>>, vector<128x128xbf16>
    %cst_18 = arith.constant dense<0.000000e+00> : vector<128x128xf32>
    %27 = tpu.matmul %25, %26, %cst_18 {dimension_numbers = #tpu.dot_dimension_numbers<[1], [0], [0], [1], [0, 0, 1, 1], [], []>} : vector<128x128xbf16>, vector<128x128xbf16>, vector<128x128xf32> -> vector<128x128xf32>
    %c0_19 = arith.constant 0 : index
    %c512 = arith.constant 512 : index
    %28 = vector.load %arg6[%c0_19, %c512] : memref<1x640xf32, #tpu.memory_space<vmem>>, vector<1x128xf32>
    %29 = vector.broadcast %28 : vector<1x128xf32> to vector<128x128xf32>
    %30 = arith.addf %27, %29 : vector<128x128xf32>
    %31 = arith.negf %30 : vector<128x128xf32>
    %32 = math.exp %31 : vector<128x128xf32>
    %cst_20 = arith.constant 1.000000e+00 : f32
    %33 = vector.broadcast %cst_20 : f32 to vector<128x128xf32>
    %34 = arith.addf %33, %32 : vector<128x128xf32>
    %35 = arith.divf %33, %34 : vector<128x128xf32>
    %36 = arith.truncf %35 : vector<128x128xf32> to vector<128x128xbf16>
    %c0_21 = arith.constant 0 : index
    %c0_22 = arith.constant 0 : index
    %37 = vector.load %arg7[%c0_21, %c0_22] : memref<128x128xbf16, #tpu.memory_space<vmem>>, vector<128x128xbf16>
    tpu.vector_store %arg7[%c0_21, %c0_22], %36 {strides = array<i32>} : memref<128x128xbf16, #tpu.memory_space<vmem>>, vector<128x128xbf16>,
    return
  }
  func.func @transform_0(%arg0: i32) -> (i32, i32) {
    %c0_i32 = arith.constant 0 : i32
    %c0_i32_0 = arith.constant 0 : i32
    return %arg0, %c0_i32 : i32, i32
  }
  func.func @transform_1(%arg0: i32) -> (i32, i32) {
    %c0_i32 = arith.constant 0 : i32
    %c0_i32_0 = arith.constant 0 : i32
    %c0_i32_1 = arith.constant 0 : i32
    return %c0_i32, %c0_i32_0 : i32, i32
  }
  func.func @transform_2(%arg0: i32) -> (i32, i32) {
    %c0_i32 = arith.constant 0 : i32
    %c0_i32_0 = arith.constant 0 : i32
    %c0_i32_1 = arith.constant 0 : i32
    return %c0_i32, %c0_i32_0 : i32, i32
  }
  func.func @transform_3(%arg0: i32) -> (i32, i32) {
    %c0_i32 = arith.constant 0 : i32
    %c0_i32_0 = arith.constant 0 : i32
    %c0_i32_1 = arith.constant 0 : i32
    return %c0_i32, %c0_i32_0 : i32, i32
  }
  func.func @transform_4(%arg0: i32) -> (i32, i32) {
    %c0_i32 = arith.constant 0 : i32
    %c0_i32_0 = arith.constant 0 : i32
    %c0_i32_1 = arith.constant 0 : i32
    return %c0_i32, %c0_i32_0 : i32, i32
  }
  func.func @transform_5(%arg0: i32) -> (i32, i32) {
    %c0_i32 = arith.constant 0 : i32
    %c0_i32_0 = arith.constant 0 : i32
    %c0_i32_1 = arith.constant 0 : i32
    return %c0_i32, %c0_i32_0 : i32, i32
  }
  func.func @transform_6(%arg0: i32) -> (i32, i32) {
    %c0_i32 = arith.constant 0 : i32
    %c0_i32_0 = arith.constant 0 : i32
    return %arg0, %c0_i32 : i32, i32
  }
}

</mosaic_0001>

<bundles_post_ra>
// kernel: simple_mlp_forward.1
= control target key start
LH: loop header
LB: loop body
LE: loop exit
PB: predicated region body
PF: predicated region fallthrough
CT: control target
= control target key end

     0   :  { %s1834_s21 = smov 0   ;;  %s2109_s0 = inlined_call_operand.vmem [shape: f32[256,32], index: 0, kind: input, shape index: {}]   ;;  %s2110_s1 = inlined_call_operand.vmem [shape: bf16[32,256], index: 1, kind: input, shape index: {}]   ;;  %s2111_s2 = inlined_call_operand.vmem [shape: bf16[256,128], index: 2, kind: input, shape index: {}]   ;;  %s2112_s3 = inlined_call_operand.vmem [shape: bf16[128,128], index: 3, kind: input, shape index: {}]   ;;  %s2113_s4 = inlined_call_operand.vmem [shape: bf16[128,128], index: 4, kind: input, shape index: {}]   ;;  %s2114_s5 = inlined_call_operand.vmem [shape: f32[1,640], index: 5, kind: input, shape index: {}]   ;;  %s2115_s6 = inlined_call_operand.vmem [shape: bf16[256,128], index: 6, kind: output, shape index: {}]  }
   0x1 LB: > { %s1350_s22 = sadd.s32 4294967295, %s1796_s21   ;;  %p1354_p0 = scmp.ge.s32.totalorder %s1796_s21, 1  ;;  %s1796_s21 = sphi %s1834_s21, %s16_s21  }
   0x2   : > { %p213_p1 = scmp.lt.s32.totalorder %s1796_s21, 3 }
   0x4   : > { %p214_p2 = pnand %p1354_p0, %p213_p1 }
   0x5   : > { %v1688_v0 = vld [vmem:[%s2110_s1 + $0x4] ss:$8 sps:$4 sm:$0xff] (!%p214_p2)   ;;  %s1355_s25 = sshll.u32 (!%p214_p2), %s1350_s22, 4  ;;  %v1690_v1 = vld [vmem:[%s2110_s1] ss:$8 sps:$4 sm:$0xff] (!%p214_p2)   ;;  %v1798_v2 = vmov (!%p214_p2), 0   ;;  %v286_v48 = vlaneseq (!%p214_p2) }
   0x6   : > { %217 = sbr.rel (%p214_p2) target bundleno = 991 (0x3df), region = 44  ;;  %373 = vmatprep.mubr.bf16.mxu0 (!%p214_p2), %v1798_v2  ;;  %p244_p3 = scmp.lt.s32.totalorder (!%p214_p2), %s1355_s25, 31  ;;  %341 = vmatprep.subr.bf16.mxu0 (!%p214_p2), %v1688_v0  ;;  %v1691_v3 = vld [vmem:[%s2110_s1 + $0x14] ss:$8 sps:$4 sm:$0xff] (!%p214_p2)   ;;  %v1693_v4 = vld [vmem:[%s2110_s1 + $0x10] ss:$8 sps:$4 sm:$0xff] (!%p214_p2)  }
   0x7   : > { %342 = vmatpush1.bf16.msra.mxu0 (!%p214_p2), %v1690_v1  ;;  %v1694_v5 = vld [vmem:[%s2111_s2 + $0x40] sm:$0xff] (!%p214_p2)   ;;  %v1696_v7 = vld [vmem:[%s2111_s2 + $0x48] sm:$0xff] (!%p214_p2)   ;;  %vm316_vm0 = vcmask (!%p214_p2), 261120   ;;  %v1698_v14 = vld [vmem:[%s2111_s2 + $0x50] sm:$0xff] (!%p214_p2)   ;;  %v287_v49 = vshrl.u32 (!%p214_p2), %v286_v48, 7 }
   0x8   : > { %343 = vmatprep.subr.bf16.mxu0 (!%p214_p2), %v1691_v3  ;;  %v1695_v6 = vld [vmem:[%s2111_s2] sm:$0xff] (!%p214_p2)   ;;  %1503 = vmatprep.subr.bf16.mxu1 (!%p214_p2), %v1694_v5  ;;  %v1697_v8 = vld [vmem:[%s2111_s2 + $0x8] sm:$0xff] (!%p214_p2)   ;;  %v1699_v15 = vld [vmem:[%s2111_s2 + $0x10] sm:$0xff] (!%p214_p2)  }
   0x9   : > { %1504 = vmatpush3.bf16.msra.mxu1 (!%p214_p2), %v1695_v6  ;;  %v1700_v17 = vld [vmem:[%s2111_s2 + $0x58] sm:$0xff] (!%p214_p2)   ;;  %v1702_v19 = vld [vmem:[%s2111_s2 + $0x60] sm:$0xff] (!%p214_p2)   ;;  %v1704_v23 = vld [vmem:[%s2111_s2 + $0x68] sm:$0xff] (!%p214_p2)   ;;  %v288_v50 = vsub.s32 (!%p214_p2), 0, %v287_v49  ;;  %v292_v52 = vsub.s32 (!%p214_p2), 1, %v287_v49 }
   0xa   : > { %1505 = vmatprep.subr.bf16.mxu1 (!%p214_p2), %v1696_v7  ;;  %v1701_v18 = vld [vmem:[%s2111_s2 + $0x18] sm:$0xff] (!%p214_p2)   ;;  %v1703_v22 = vld [vmem:[%s2111_s2 + $0x20] sm:$0xff] (!%p214_p2)   ;;  %v1705_v40 = vld [vmem:[%s2111_s2 + $0x28] sm:$0xff] (!%p214_p2)  }
   0xb   : > { %344 = vmatpush1.bf16.msra.mxu0 (!%p214_p2), %v1693_v4  ;;  %v1706_v41 = vld [vmem:[%s2111_s2 + $0x70] sm:$0xff] (!%p214_p2)   ;;  %v1708_v43 = vld [vmem:[%s2111_s2 + $0x78] sm:$0xff] (!%p214_p2)   ;;  %v1710_v45 = vld [vmem:[%s2112_s3] sm:$0xff] (!%p214_p2)  }
   0xc   : > { %v1707_v42 = vld [vmem:[%s2111_s2 + $0x30] sm:$0xff] (!%p214_p2)   ;;  %v1709_v44 = vld [vmem:[%s2111_s2 + $0x38] sm:$0xff] (!%p214_p2)   ;;  %v1711_v46 = vld [vmem:[%s2112_s3 + $0x8] sm:$0xff] (!%p214_p2)   ;;  %1599 = vmatprep.subr.bf16.mxu0 (!%p214_p2), %v1710_v45 }
   0xd   : > { %s2117_s25 = smov (!%p244_p3, %s1355_s25), 31  ;;  %1506 = vmatpush3.bf16.msra.mxu1 %v1697_v8  ;;  %v1712_v47 = vld [vmem:[%s2112_s3 + $0x10] sm:$0xff]   ;;  %v284_v51 = vld [vmem:[%s2114_s5] sm:$0x3] }
   0xe   : > { %s1356_s12 = sshll.u32 %s2117_s25, 3  ;;  %1507 = vmatprep.subr.bf16.mxu1 %v1698_v14  ;;  %v1954_v53 = vrot.slane %v284_v51, %v288_v50  ;;  %v1956_v54 = vrot.slane %v284_v51, %v292_v52  ;;  %s1358_s19 = sshll.u32 %s2117_s25, 2 }
   0xf   : > { %s1870_s17 = scalar_lea.vmem %s2109_s0, %s1356_s12  ;;  %s2088_s22 = scalar_lea.vmem %s2115_s6, %s1358_s19 }
  0x10   : > { %v256_v9 = vld [vmem:[%s1870_s17] sm:$0xff]  ;;  %v257_v10 = vld [vmem:[%s1870_s17 + $0x8] sm:$0xff]  ;;  %v258_v12 = vld [vmem:[%s1870_s17 + $0x10] sm:$0xff] }
  0x11   : > { %v272_v11 = vpack.c.bf16 %v257_v10, %v256_v9  ;;  %v259_v13 = vld [vmem:[%s1870_s17 + $0x18] sm:$0xff]  ;;  %1508 = vmatpush3.bf16.msra.mxu1 %v1699_v15  ;;  %v260_v20 = vld [vmem:[%s1870_s17 + $0x20] sm:$0xff]  ;;  %v261_v21 = vld [vmem:[%s1870_s17 + $0x28] sm:$0xff] }
  0x12   : > { %v273_v16 = vpack.c.bf16 %v259_v13, %v258_v12  ;;  %1509 = vmatprep.subr.bf16.mxu1 %v1700_v17  ;;  %v274_v24 = vpack.c.bf16 %v261_v21, %v260_v20  ;;  %v262_v25 = vld [vmem:[%s1870_s17 + $0x30] sm:$0xff]  ;;  %v263_v26 = vld [vmem:[%s1870_s17 + $0x38] sm:$0xff]  ;;  %v264_v28 = vld [vmem:[%s1870_s17 + $0x40] sm:$0xff] }
  0x13   : > { %1363 = vmatmul.mubr.msk.bf16.vlgmr.msra.gmra.mrb[0].mxu0 %vm316_vm0, %v272_v11  ;;  %v275_v27 = vpack.c.bf16 %v263_v26, %v262_v25  ;;  %v265_v29 = vld [vmem:[%s1870_s17 + $0x48] sm:$0xff]  ;;  %v266_v31 = vld [vmem:[%s1870_s17 + $0x50] sm:$0xff]  ;;  %v267_v32 = vld [vmem:[%s1870_s17 + $0x58] sm:$0xff] }
  0x14   : > { %383 = vmatprep.mubr.bf16.mxu0 %v1798_v2  ;;  %v276_v30 = vpack.c.bf16 %v265_v29, %v264_v28  ;;  %v277_v33 = vpack.c.bf16 %v267_v32, %v266_v31  ;;  %v268_v34 = vld [vmem:[%s1870_s17 + $0x60] sm:$0xff]  ;;  %v269_v35 = vld [vmem:[%s1870_s17 + $0x68] sm:$0xff]  ;;  %v270_v37 = vld [vmem:[%s1870_s17 + $0x70] sm:$0xff]  ;;  %1600 = vmatpush3.bf16.msra.mxu0 %v1710_v45 }
  0x15   : > { %1510 = vmatpush3.bf16.msra.mxu1 %v1701_v18  ;;  %v278_v36 = vpack.c.bf16 %v269_v35, %v268_v34  ;;  %v271_v38 = vld [vmem:[%s1870_s17 + $0x78] sm:$0xff]  ;;  %1601 = vmatprep.subr.bf16.mxu0 %v1711_v46 }
  0x16   : > { %1511 = vmatprep.subr.bf16.mxu1 %v1702_v19  ;;  %v279_v39 = vpack.c.bf16 %v271_v38, %v270_v37 }
  0x18   : > { %1602 = vmatpush3.bf16.msra.mxu0 %v1711_v46 }
  0x19   : > { %1512 = vmatpush3.bf16.msra.mxu1 %v1703_v22  ;;  %1603 = vmatprep.subr.bf16.mxu0 %v1712_v47 }
  0x1a   : > { %1513 = vmatprep.subr.bf16.mxu1 %v1704_v23 }
  0x1b   : > { %1364 = vmatmul.mubr.msk.bf16.gmra.mrb[4].mxu0 %vm316_vm0, %v273_v16 }
  0x1c   : > { %393 = vmatprep.mubr.bf16.mxu0 %v1798_v2  ;;  %1604 = vmatpush3.bf16.msra.mxu0 %v1712_v47 }
  0x1d   : > { %1514 = vmatpush3.bf16.msra.mxu1 %v1705_v40 }
  0x1e   : > { %1515 = vmatprep.subr.bf16.mxu1 %v1706_v41 }
  0x21   : > { %1516 = vmatpush3.bf16.msra.mxu1 %v1707_v42 }
  0x22   : > { %1517 = vmatprep.subr.bf16.mxu1 %v1708_v43 }
  0x23   : > { %1365 = vmatmul.mubr.msk.bf16.gmra.mrb[8].mxu0 %vm316_vm0, %v274_v24 }
  0x24   : > { %403 = vmatprep.mubr.bf16.mxu0 %v1798_v2 }
  0x25   : > { %1518 = vmatpush3.bf16.msra.mxu1 %v1709_v44 }
  0x2b   : > { %1366 = vmatmul.mubr.msk.bf16.gmra.mrb[12].mxu0 %vm316_vm0, %v275_v27 }
  0x2c   : > { %413 = vmatprep.mubr.bf16.mxu0 %v1798_v2 }
  0x33   : > { %1367 = vmatmul.mubr.msk.bf16.gmra.mrb[16].mxu0 %vm316_vm0, %v276_v30 }
  0x34   : > { %423 = vmatprep.mubr.bf16.mxu0 %v1798_v2 }
  0x3b   : > { %1368 = vmatmul.mubr.msk.bf16.gmra.mrb[20].mxu0 %vm316_vm0, %v277_v33 }
  0x3c   : > { %433 = vmatprep.mubr.bf16.mxu0 %v1798_v2 }
  0x43   : > { %1369 = vmatmul.mubr.msk.bf16.gmra.mrb[24].mxu0 %vm316_vm0, %v278_v36 }
  0x44   : > { %443 = vmatprep.mubr.bf16.mxu0 %v1798_v2 }
  0x4b   : > { %1370 = vmatmul.mubr.msk.bf16.gmra.mrb[28].mxu0 %vm316_vm0, %v279_v39 }
  0xe6   : > { %v375_v55 = vpop.f32.mrb[0].mxu0 }
  0xe7   : > { %v376_v56 = vadd.f32 %v375_v55, %v1954_v53  ;;  %v377_v57 = vpop.f32.mrb[1].mxu0 }
  0xe8   : > { %v378_v58 = vadd.f32 %v377_v57, %v1956_v54  ;;  %v379_v59 = vpop.f32.mrb[2].mxu0 }
  0xe9   : > { %v380_v60 = vadd.f32 %v379_v59, %v1954_v53  ;;  %v381_v61 = vpop.f32.mrb[3].mxu0  ;;  %v454_v63 = vmax.f32 %v376_v56, 0.0 }
  0xea   : > { %v382_v62 = vadd.f32 %v381_v61, %v1956_v54  ;;  %v455_v1 = vmax.f32 %v378_v58, 0.0 }
  0xeb   : > { %v456_v0 = vmax.f32 %v380_v60, 0.0 }
  0xec   : > { %v457_v2 = vmax.f32 %v382_v62, 0.0 }
  0xed   : > { %v486_v3 = vpack.c.bf16 %v456_v0, %v454_v63 }
  0xee   : > { %v385_v4 = vpop.f32.mrb[4].mxu0  ;;  %v487_v5 = vpack.c.bf16 %v457_v2, %v455_v1 }
  0xef   : > { %v386_v6 = vadd.f32 %v385_v4, %v1954_v53  ;;  %v387_v7 = vpop.f32.mrb[5].mxu0 }
  0xf0   : > { %v388_v8 = vadd.f32 %v387_v7, %v1956_v54  ;;  %v389_v9 = vpop.f32.mrb[6].mxu0  ;;  %669 = vmatprep.mubr.bf16.mxu1 %v487_v5 }
  0xf1   : > { %v390_v10 = vadd.f32 %v389_v9, %v1954_v53  ;;  %v391_v11 = vpop.f32.mrb[7].mxu0  ;;  %670 = vmatmul.mubr.bf16.vlgmr.msra.gmra.mrb[0].mxu1 %v486_v3  ;;  %v458_v13 = vmax.f32 %v386_v6, 0.0 }
  0xf2   : > { %v392_v12 = vadd.f32 %v391_v11, %v1956_v54  ;;  %v459_v15 = vmax.f32 %v388_v8, 0.0 }
  0xf3   : > { %v460_v14 = vmax.f32 %v390_v10, 0.0 }
  0xf4   : > { %v461_v16 = vmax.f32 %v392_v12, 0.0 }
  0xf5   : > { %v488_v17 = vpack.c.bf16 %v460_v14, %v458_v13 }
  0xf6   : > { %v489_v18 = vpack.c.bf16 %v461_v16, %v459_v15  ;;  %v395_v19 = vpop.f32.mrb[8].mxu0 }
  0xf7   : > { %v396_v20 = vadd.f32 %v395_v19, %v1954_v53  ;;  %v397_v21 = vpop.f32.mrb[9].mxu0 }
  0xf8   : > { %v398_v22 = vadd.f32 %v397_v21, %v1956_v54  ;;  %v399_v23 = vpop.f32.mrb[10].mxu0  ;;  %677 = vmatprep.mubr.bf16.mxu1 %v489_v18 }
  0xf9   : > { %v400_v24 = vadd.f32 %v399_v23, %v1954_v53  ;;  %v401_v25 = vpop.f32.mrb[11].mxu0  ;;  %678 = vmatmul.mubr.bf16.gmra.mrb[4].mxu1 %v488_v17  ;;  %v462_v27 = vmax.f32 %v396_v20, 0.0 }
  0xfa   : > { %v402_v26 = vadd.f32 %v401_v25, %v1956_v54  ;;  %v463_v29 = vmax.f32 %v398_v22, 0.0 }
  0xfb   : > { %v464_v28 = vmax.f32 %v400_v24, 0.0 }
  0xfc   : > { %v465_v30 = vmax.f32 %v402_v26, 0.0 }
  0xfd   : > { %v490_v31 = vpack.c.bf16 %v464_v28, %v462_v27 }
  0xfe   : > { %v491_v32 = vpack.c.bf16 %v465_v30, %v463_v29  ;;  %v405_v33 = vpop.f32.mrb[12].mxu0 }
  0xff   : > { %v406_v34 = vadd.f32 %v405_v33, %v1954_v53  ;;  %v407_v35 = vpop.f32.mrb[13].mxu0 }
 0x100   : > { %v408_v36 = vadd.f32 %v407_v35, %v1956_v54  ;;  %v409_v37 = vpop.f32.mrb[14].mxu0  ;;  %685 = vmatprep.mubr.bf16.mxu1 %v491_v32 }
 0x101   : > { %v410_v38 = vadd.f32 %v409_v37, %v1954_v53  ;;  %v411_v39 = vpop.f32.mrb[15].mxu0  ;;  %686 = vmatmul.mubr.bf16.gmra.mrb[8].mxu1 %v490_v31  ;;  %v466_v41 = vmax.f32 %v406_v34, 0.0 }
 0x102   : > { %v412_v40 = vadd.f32 %v411_v39, %v1956_v54  ;;  %v467_v43 = vmax.f32 %v408_v36, 0.0 }
 0x103   : > { %v468_v42 = vmax.f32 %v410_v38, 0.0 }
 0x104   : > { %v469_v44 = vmax.f32 %v412_v40, 0.0 }
 0x105   : > { %v492_v45 = vpack.c.bf16 %v468_v42, %v466_v41  ;;  %v1713_v41 = vld [vmem:[%s2112_s3 + $0x18] sm:$0xff]   ;;  %v1716_v42 = vld [vmem:[%s2112_s3 + $0x30] sm:$0xff]  }
 0x106   : > { %v493_v46 = vpack.c.bf16 %v469_v44, %v467_v43  ;;  %v415_v47 = vpop.f32.mrb[16].mxu0  ;;  %1605 = vmatprep.subr.bf16.mxu0 %v1713_v41  ;;  %v1717_v43 = vld [vmem:[%s2112_s3 + $0x38] sm:$0xff]   ;;  %v1718_v44 = vld [vmem:[%s2113_s4] sm:$0xff]  }
 0x107   : > { %v416_v48 = vadd.f32 %v415_v47, %v1954_v53  ;;  %v417_v49 = vpop.f32.mrb[17].mxu0  ;;  %1606 = vmatpush3.bf16.msra.mxu0 %v1713_v41  ;;  %1663 = vmatprep.subr.bf16.mxu1 %v1718_v44  ;;  %v2017_v47 = vld [vmem:[%s2113_s4 + $0x18] sm:$0xff]  }
 0x108   : > { %v418_v50 = vadd.f32 %v417_v49, %v1956_v54  ;;  %v419_v51 = vpop.f32.mrb[18].mxu0  ;;  %693 = vmatprep.mubr.bf16.mxu1 %v493_v46  ;;  %1671 = vmatpush3.bf16.msra.mxu1 %v1718_v44  ;;  %v1720_v46 = vld [vmem:[%s2113_s4 + $0x10] sm:$0xff]   ;;  %v2030_v49 = vld [vmem:[%s2113_s4 + $0x28] sm:$0xff]  }
 0x109   : > { %v420_v52 = vadd.f32 %v419_v51, %v1954_v53  ;;  %v421_v55 = vpop.f32.mrb[19].mxu0  ;;  %694 = vmatmul.mubr.bf16.gmra.mrb[12].mxu1 %v492_v45  ;;  %v470_v57 = vmax.f32 %v416_v48, 0.0  ;;  %v1719_v45 = vld [vmem:[%s2113_s4 + $0x8] sm:$0xff]   ;;  %v2023_v48 = vld [vmem:[%s2113_s4 + $0x20] sm:$0xff]  }
 0x10a   : > { %v422_v56 = vadd.f32 %v421_v55, %v1956_v54  ;;  %v471_v59 = vmax.f32 %v418_v50, 0.0  ;;  %1664 = vmatprep.subr.bf16.mxu1 %v1719_v45  ;;  %v2038_v51 = vld [vmem:[%s2114_s5 + $0x2] ss:$0 sm:$0xff] }
 0x10b   : > { %v472_v58 = vmax.f32 %v420_v52, 0.0 }
 0x10c   : > { %v473_v60 = vmax.f32 %v422_v56, 0.0  ;;  %1672 = vmatpush3.bf16.msra.mxu1 %v1719_v45 }
 0x10d   : > { %v494_v61 = vpack.c.bf16 %v472_v58, %v470_v57  ;;  %1665 = vmatprep.subr.bf16.mxu1 %v1720_v46 }
 0x10e   : > { %v495_v62 = vpack.c.bf16 %v473_v60, %v471_v59  ;;  %v425_v63 = vpop.f32.mrb[20].mxu0 }
 0x10f   : > { %v426_v0 = vadd.f32 %v425_v63, %v1954_v53  ;;  %v427_v1 = vpop.f32.mrb[21].mxu0 }
 0x110   : > { %v428_v2 = vadd.f32 %v427_v1, %v1956_v54  ;;  %v429_v3 = vpop.f32.mrb[22].mxu0  ;;  %701 = vmatprep.mubr.bf16.mxu1 %v495_v62  ;;  %1673 = vmatpush3.bf16.msra.mxu1 %v1720_v46 }
 0x111   : > { %v430_v4 = vadd.f32 %v429_v3, %v1954_v53  ;;  %v431_v5 = vpop.f32.mrb[23].mxu0  ;;  %702 = vmatmul.mubr.bf16.gmra.mrb[16].mxu1 %v494_v61  ;;  %v474_v7 = vmax.f32 %v426_v0, 0.0  ;;  %1666 = vmatprep.subr.bf16.mxu1 %v2017_v47 }
 0x112   : > { %v432_v6 = vadd.f32 %v431_v5, %v1956_v54  ;;  %v475_v9 = vmax.f32 %v428_v2, 0.0 }
 0x113   : > { %v476_v8 = vmax.f32 %v430_v4, 0.0 }
 0x114   : > { %v477_v10 = vmax.f32 %v432_v6, 0.0  ;;  %1674 = vmatpush3.bf16.msra.mxu1 %v2017_v47 }
 0x115   : > { %v496_v11 = vpack.c.bf16 %v476_v8, %v474_v7  ;;  %1667 = vmatprep.subr.bf16.mxu1 %v2023_v48 }
 0x116   : > { %v497_v12 = vpack.c.bf16 %v477_v10, %v475_v9  ;;  %v435_v13 = vpop.f32.mrb[24].mxu0 }
 0x117   : > { %v436_v14 = vadd.f32 %v435_v13, %v1954_v53  ;;  %v437_v15 = vpop.f32.mrb[25].mxu0 }
 0x118   : > { %v438_v16 = vadd.f32 %v437_v15, %v1956_v54  ;;  %v439_v17 = vpop.f32.mrb[26].mxu0  ;;  %709 = vmatprep.mubr.bf16.mxu1 %v497_v12  ;;  %1675 = vmatpush3.bf16.msra.mxu1 %v2023_v48 }
 0x119   : > { %v440_v18 = vadd.f32 %v439_v17, %v1954_v53  ;;  %v441_v19 = vpop.f32.mrb[27].mxu0  ;;  %710 = vmatmul.mubr.bf16.gmra.mrb[20].mxu1 %v496_v11  ;;  %v478_v21 = vmax.f32 %v436_v14, 0.0  ;;  %1668 = vmatprep.subr.bf16.mxu1 %v2030_v49 }
 0x11a   : > { %v442_v20 = vadd.f32 %v441_v19, %v1956_v54  ;;  %v479_v23 = vmax.f32 %v438_v16, 0.0 }
 0x11b   : > { %v480_v22 = vmax.f32 %v440_v18, 0.0 }
 0x11c   : > { %v481_v24 = vmax.f32 %v442_v20, 0.0  ;;  %1676 = vmatpush3.bf16.msra.mxu1 %v2030_v49 }
 0x11d   : > { %v498_v25 = vpack.c.bf16 %v480_v22, %v478_v21 }
 0x11e   : > { %v499_v26 = vpack.c.bf16 %v481_v24, %v479_v23  ;;  %v445_v27 = vpop.f32.mrb[28].mxu0 }
 0x11f   : > { %v446_v28 = vadd.f32 %v445_v27, %v1954_v53  ;;  %v447_v29 = vpop.f32.mrb[29].mxu0 }
 0x120   : > { %v448_v30 = vadd.f32 %v447_v29, %v1956_v54  ;;  %v449_v31 = vpop.f32.mrb[30].mxu0  ;;  %717 = vmatprep.mubr.bf16.mxu1 %v499_v26 }
 0x121   : > { %v450_v32 = vadd.f32 %v449_v31, %v1954_v53  ;;  %v451_v33 = vpop.f32.mrb[31].mxu0  ;;  %718 = vmatmul.mubr.bf16.gmra.mrb[24].mxu1 %v498_v25  ;;  %v482_v35 = vmax.f32 %v446_v28, 0.0  ;;  %v1714_v53 = vld [vmem:[%s2112_s3 + $0x20] sm:$0xff]  }
 0x122   : > { %v452_v34 = vadd.f32 %v451_v33, %v1956_v54  ;;  %v483_v37 = vmax.f32 %v448_v30, 0.0  ;;  %1607 = vmatprep.subr.bf16.mxu0 %v1714_v53  ;;  %v1715_v54 = vld [vmem:[%s2112_s3 + $0x28] sm:$0xff]  }
 0x123   : > { %v484_v36 = vmax.f32 %v450_v32, 0.0  ;;  %1608 = vmatpush3.bf16.msra.mxu0 %v1714_v53 }
 0x124   : > { %v485_v38 = vmax.f32 %v452_v34, 0.0  ;;  %1609 = vmatprep.subr.bf16.mxu0 %v1715_v54 }
 0x125   : > { %v500_v39 = vpack.c.bf16 %v484_v36, %v482_v35 }
 0x126   : > { %v501_v40 = vpack.c.bf16 %v485_v38, %v483_v37 }
 0x127   : > { %1610 = vmatpush3.bf16.msra.mxu0 %v1715_v54 }
 0x128   : > { %725 = vmatprep.mubr.bf16.mxu1 %v501_v40  ;;  %1611 = vmatprep.subr.bf16.mxu0 %v1716_v42 }
 0x129   : > { %726 = vmatmul.mubr.bf16.gmra.mrb[28].mxu1 %v500_v39 }
 0x12b   : > { %1612 = vmatpush3.bf16.msra.mxu0 %v1716_v42 }
 0x12c   : > { %1613 = vmatprep.subr.bf16.mxu0 %v1717_v43 }
 0x12f   : > { %1614 = vmatpush3.bf16.msra.mxu0 %v1717_v43 }
 0x130   : > { %1631 = vmatprep.subr.bf16.mxu0 %v1718_v44 }
 0x1c4   : > { %v1519_v50 = vpop.f32.mrb[0].mxu1 }
 0x1c5   : > { %v1520_v52 = vpop.f32.mrb[1].mxu1 }
 0x1c6   : > { %v1521_v55 = vadd.f32 %v1520_v52, %v1519_v50  ;;  %v1522_v56 = vpop.f32.mrb[2].mxu1 }
 0x1c7   : > { %v1523_v57 = vpop.f32.mrb[3].mxu1 }
 0x1c8   : > { %v672_v58 = vadd.f32 %v1521_v55, %v2038_v51  ;;  %v1524_v59 = vadd.f32 %v1523_v57, %v1522_v56 }
 0x1ca   : > { %v675_v60 = vadd.f32 %v1524_v59, %v2038_v51  ;;  %v734_v61 = vmax.f32 %v672_v58, 0.0 }
 0x1cc   : > { %v735_v62 = vmax.f32 %v675_v60, 0.0  ;;  %v1525_v63 = vpop.f32.mrb[4].mxu1 }
 0x1cd   : > { %v1526_v0 = vpop.f32.mrb[5].mxu1 }
 0x1ce   : > { %v1527_v1 = vadd.f32 %v1526_v0, %v1525_v63  ;;  %v1528_v2 = vpop.f32.mrb[6].mxu1  ;;  %v750_v3 = vpack.c.bf16 %v735_v62, %v734_v61 }
 0x1cf   : > { %v1529_v4 = vpop.f32.mrb[7].mxu1 }
 0x1d0   : > { %v680_v5 = vadd.f32 %v1527_v1, %v2038_v51  ;;  %v1530_v6 = vadd.f32 %v1529_v4, %v1528_v2  ;;  %1615 = vmatprep.mubr.bf16.mxu0 %v750_v3 }
 0x1d2   : > { %v683_v7 = vadd.f32 %v1530_v6, %v2038_v51  ;;  %v736_v8 = vmax.f32 %v680_v5, 0.0 }
 0x1d4   : > { %v737_v9 = vmax.f32 %v683_v7, 0.0  ;;  %v1531_v10 = vpop.f32.mrb[8].mxu1 }
 0x1d5   : > { %v1532_v11 = vpop.f32.mrb[9].mxu1 }
 0x1d6   : > { %v751_v12 = vpack.c.bf16 %v737_v9, %v736_v8  ;;  %v1533_v13 = vadd.f32 %v1532_v11, %v1531_v10  ;;  %v1534_v14 = vpop.f32.mrb[10].mxu1 }
 0x1d7   : > { %v1535_v15 = vpop.f32.mrb[11].mxu1 }
 0x1d8   : > { %v688_v16 = vadd.f32 %v1533_v13, %v2038_v51  ;;  %v1536_v17 = vadd.f32 %v1535_v15, %v1534_v14  ;;  %1616 = vmatmul.mubr.bf16.vlgmr.msra.gmra.mrb[32].mxu0 %v751_v12  ;;  %v1724_v14 = vld [vmem:[%s2113_s4 + $0x30] sm:$0xff]   ;;  %v1725_v15 = vld [vmem:[%s2113_s4 + $0x38] sm:$0xff]  }
 0x1d9   : > { %1632 = vmatpush3.bf16.msra.mxu0 %v1718_v44  ;;  %1669 = vmatprep.subr.bf16.mxu1 %v1724_v14 }
 0x1da   : > { %v691_v18 = vadd.f32 %v1536_v17, %v2038_v51  ;;  %1633 = vmatprep.subr.bf16.mxu0 %v1719_v45  ;;  %v738_v19 = vmax.f32 %v688_v16, 0.0  ;;  %1677 = vmatpush3.bf16.msra.mxu1 %v1724_v14 }
 0x1db   : > { %1670 = vmatprep.subr.bf16.mxu1 %v1725_v15 }
 0x1dc   : > { %v739_v20 = vmax.f32 %v691_v18, 0.0  ;;  %v1537_v21 = vpop.f32.mrb[12].mxu1 }
 0x1dd   : > { %v1538_v22 = vpop.f32.mrb[13].mxu1  ;;  %1634 = vmatpush3.bf16.msra.mxu0 %v1719_v45 }
 0x1de   : > { %v1539_v23 = vadd.f32 %v1538_v22, %v1537_v21  ;;  %v1540_v24 = vpop.f32.mrb[14].mxu1  ;;  %v752_v25 = vpack.c.bf16 %v739_v20, %v738_v19  ;;  %1635 = vmatprep.subr.bf16.mxu0 %v1720_v46  ;;  %1678 = vmatpush3.bf16.msra.mxu1 %v1725_v15 }
 0x1df   : > { %v1541_v26 = vpop.f32.mrb[15].mxu1 }
 0x1e0   : > { %v696_v27 = vadd.f32 %v1539_v23, %v2038_v51  ;;  %v1542_v28 = vadd.f32 %v1541_v26, %v1540_v24  ;;  %1619 = vmatprep.mubr.bf16.mxu0 %v752_v25 }
 0x1e1   : > { %1636 = vmatpush3.bf16.msra.mxu0 %v1720_v46 }
 0x1e2   : > { %v699_v29 = vadd.f32 %v1542_v28, %v2038_v51  ;;  %1637 = vmatprep.subr.bf16.mxu0 %v2017_v47  ;;  %v740_v30 = vmax.f32 %v696_v27, 0.0 }
 0x1e4   : > { %v741_v31 = vmax.f32 %v699_v29, 0.0  ;;  %v1543_v32 = vpop.f32.mrb[16].mxu1 }
 0x1e5   : > { %v1544_v33 = vpop.f32.mrb[17].mxu1  ;;  %1638 = vmatpush3.bf16.msra.mxu0 %v2017_v47 }
 0x1e6   : > { %v1545_v34 = vadd.f32 %v1544_v33, %v1543_v32  ;;  %v1546_v35 = vpop.f32.mrb[18].mxu1  ;;  %v753_v36 = vpack.c.bf16 %v741_v31, %v740_v30  ;;  %1639 = vmatprep.subr.bf16.mxu0 %v2023_v48 }
 0x1e7   : > { %v1547_v37 = vpop.f32.mrb[19].mxu1 }
 0x1e8   : > { %v704_v38 = vadd.f32 %v1545_v34, %v2038_v51  ;;  %v1548_v39 = vadd.f32 %v1547_v37, %v1546_v35  ;;  %1620 = vmatmul.mubr.bf16.gmra.mrb[36].mxu0 %v753_v36 }
 0x1e9   : > { %1640 = vmatpush3.bf16.msra.mxu0 %v2023_v48 }
 0x1ea   : > { %v707_v40 = vadd.f32 %v1548_v39, %v2038_v51  ;;  %1641 = vmatprep.subr.bf16.mxu0 %v2030_v49  ;;  %v742_v41 = vmax.f32 %v704_v38, 0.0 }
 0x1ec   : > { %v743_v53 = vmax.f32 %v707_v40, 0.0  ;;  %v1549_v54 = vpop.f32.mrb[20].mxu1 }
 0x1ed   : > { %v1550_v42 = vpop.f32.mrb[21].mxu1  ;;  %1642 = vmatpush3.bf16.msra.mxu0 %v2030_v49 }
 0x1ee   : > { %v1551_v43 = vadd.f32 %v1550_v42, %v1549_v54  ;;  %v1552_v44 = vpop.f32.mrb[22].mxu1  ;;  %v754_v45 = vpack.c.bf16 %v743_v53, %v742_v41  ;;  %1643 = vmatprep.subr.bf16.mxu0 %v1724_v14 }
 0x1ef   : > { %v1553_v46 = vpop.f32.mrb[23].mxu1 }
 0x1f0   : > { %v712_v47 = vadd.f32 %v1551_v43, %v2038_v51  ;;  %v1554_v50 = vadd.f32 %v1553_v46, %v1552_v44  ;;  %1623 = vmatprep.mubr.bf16.mxu0 %v754_v45 }
 0x1f1   : > { %1644 = vmatpush3.bf16.msra.mxu0 %v1724_v14 }
 0x1f2   : > { %v715_v48 = vadd.f32 %v1554_v50, %v2038_v51  ;;  %v744_v52 = vmax.f32 %v712_v47, 0.0  ;;  %1645 = vmatprep.subr.bf16.mxu0 %v1725_v15 }
 0x1f4   : > { %v745_v55 = vmax.f32 %v715_v48, 0.0  ;;  %v1555_v56 = vpop.f32.mrb[24].mxu1 }
 0x1f5   : > { %v1556_v57 = vpop.f32.mrb[25].mxu1  ;;  %1646 = vmatpush3.bf16.msra.mxu0 %v1725_v15 }
 0x1f6   : > { %v1557_v58 = vadd.f32 %v1556_v57, %v1555_v56  ;;  %v1558_v59 = vpop.f32.mrb[26].mxu1  ;;  %v755_v60 = vpack.c.bf16 %v745_v55, %v744_v52 }
 0x1f7   : > { %v1559_v61 = vpop.f32.mrb[27].mxu1 }
 0x1f8   : > { %v720_v49 = vadd.f32 %v1557_v58, %v2038_v51  ;;  %v1560_v62 = vadd.f32 %v1559_v61, %v1558_v59  ;;  %1624 = vmatmul.mubr.bf16.gmra.mrb[40].mxu0 %v755_v60 }
 0x1fa   : > { %v723_v63 = vadd.f32 %v1560_v62, %v2038_v51  ;;  %v746_v0 = vmax.f32 %v720_v49, 0.0 }
 0x1fc   : > { %v747_v1 = vmax.f32 %v723_v63, 0.0  ;;  %v1561_v2 = vpop.f32.mrb[28].mxu1 }
 0x1fd   : > { %v1562_v3 = vpop.f32.mrb[29].mxu1 }
 0x1fe   : > { %v1563_v4 = vadd.f32 %v1562_v3, %v1561_v2  ;;  %v1564_v5 = vpop.f32.mrb[30].mxu1  ;;  %v756_v6 = vpack.c.bf16 %v747_v1, %v746_v0 }
 0x1ff   : > { %v1565_v7 = vpop.f32.mrb[31].mxu1 }
 0x200   : > { %v728_v8 = vadd.f32 %v1563_v4, %v2038_v51  ;;  %v1566_v9 = vadd.f32 %v1565_v7, %v1564_v5  ;;  %1627 = vmatprep.mubr.bf16.mxu0 %v756_v6 }
 0x202   : > { %v731_v10 = vadd.f32 %v1566_v9, %v2038_v51  ;;  %v748_v11 = vmax.f32 %v728_v8, 0.0  ;;  %v1388_v51 = vld [vmem:[%s2114_s5 + $0x3] ss:$0 sm:$0xff]  ;;  %v2074_v9 = vld [vmem:[%s2114_s5 + $0x4] ss:$0 sm:$0xff] }
 0x204   : > { %v749_v12 = vmax.f32 %v731_v10, 0.0 }
 0x206   : > { %v757_v13 = vpack.c.bf16 %v749_v12, %v748_v11 }
 0x208   : > { %1628 = vmatmul.mubr.bf16.gmra.mrb[44].mxu0 %v757_v13 }
 0x2ab   : > { %v1617_v16 = vpop.f32.mrb[32].mxu0 }
 0x2ac   : > { %v872_v17 = vadd.f32 %v1617_v16, %v1388_v51  ;;  %v863_v18 = vpop.f32.mrb[33].mxu0 }
 0x2ad   : > { %v864_v19 = vadd.f32 %v1388_v51, %v863_v18  ;;  %v1618_v20 = vpop.f32.mrb[34].mxu0 }
 0x2ae   : > { %v875_v21 = vadd.f32 %v1618_v20, %v1388_v51  ;;  %v866_v22 = vpop.f32.mrb[35].mxu0  ;;  %v928_v24 = vmax.f32 %v872_v17, 0.0 }
 0x2af   : > { %v867_v23 = vadd.f32 %v1388_v51, %v866_v22  ;;  %v926_v26 = vmax.f32 %v864_v19, 0.0 }
 0x2b0   : > { %v929_v25 = vmax.f32 %v875_v21, 0.0 }
 0x2b1   : > { %v927_v27 = vmax.f32 %v867_v23, 0.0 }
 0x2b2   : > { %v943_v28 = vpack.c.bf16 %v929_v25, %v928_v24 }
 0x2b3   : > { %v942_v29 = vpack.c.bf16 %v927_v27, %v926_v26 }
 0x2b5   : > { %1647 = vmatprep.mubr.bf16.mxu0 %v942_v29 }
 0x2b6   : > { %1648 = vmatmul.mubr.bf16.vlgmr.msra.gmra.mrb[48].mxu0 %v943_v28 }
 0x2bb   : > { %v1621_v30 = vpop.f32.mrb[36].mxu0 }
 0x2bc   : > { %v888_v31 = vadd.f32 %v1621_v30, %v1388_v51  ;;  %v879_v32 = vpop.f32.mrb[37].mxu0 }
 0x2bd   : > { %v880_v33 = vadd.f32 %v1388_v51, %v879_v32  ;;  %v1622_v34 = vpop.f32.mrb[38].mxu0 }
 0x2be   : > { %v891_v35 = vadd.f32 %v1622_v34, %v1388_v51  ;;  %v882_v36 = vpop.f32.mrb[39].mxu0  ;;  %v932_v38 = vmax.f32 %v888_v31, 0.0 }
 0x2bf   : > { %v883_v37 = vadd.f32 %v1388_v51, %v882_v36  ;;  %v930_v40 = vmax.f32 %v880_v33, 0.0 }
 0x2c0   : > { %v933_v39 = vmax.f32 %v891_v35, 0.0 }
 0x2c1   : > { %v931_v41 = vmax.f32 %v883_v37, 0.0 }
 0x2c2   : > { %v945_v53 = vpack.c.bf16 %v933_v39, %v932_v38 }
 0x2c3   : > { %v944_v54 = vpack.c.bf16 %v931_v41, %v930_v40 }
 0x2c5   : > { %1651 = vmatprep.mubr.bf16.mxu1 %v944_v54 }
 0x2c6   : > { %1652 = vmatmul.mubr.bf16.vlgmr.msra.gmra.mrb[32].mxu1 %v945_v53 }
 0x2cb   : > { %v1625_v42 = vpop.f32.mrb[40].mxu0 }
 0x2cc   : > { %v904_v43 = vadd.f32 %v1625_v42, %v1388_v51  ;;  %v895_v44 = vpop.f32.mrb[41].mxu0 }
 0x2cd   : > { %v896_v45 = vadd.f32 %v1388_v51, %v895_v44  ;;  %v1626_v46 = vpop.f32.mrb[42].mxu0 }
 0x2ce   : > { %v907_v47 = vadd.f32 %v1626_v46, %v1388_v51  ;;  %v898_v50 = vpop.f32.mrb[43].mxu0  ;;  %v936_v52 = vmax.f32 %v904_v43, 0.0 }
 0x2cf   : > { %v899_v48 = vadd.f32 %v1388_v51, %v898_v50  ;;  %v934_v56 = vmax.f32 %v896_v45, 0.0 }
 0x2d0   : > { %v937_v55 = vmax.f32 %v907_v47, 0.0 }
 0x2d1   : > { %v935_v57 = vmax.f32 %v899_v48, 0.0 }
 0x2d2   : > { %v947_v58 = vpack.c.bf16 %v937_v55, %v936_v52 }
 0x2d3   : > { %v946_v59 = vpack.c.bf16 %v935_v57, %v934_v56 }
 0x2d5   : > { %1655 = vmatprep.mubr.bf16.mxu1 %v946_v59 }
 0x2d6   : > { %1656 = vmatmul.mubr.bf16.gmra.mrb[36].mxu1 %v947_v58 }
 0x2db   : > { %v1629_v60 = vpop.f32.mrb[44].mxu0 }
 0x2dc   : > { %v920_v61 = vadd.f32 %v1629_v60, %v1388_v51  ;;  %v911_v49 = vpop.f32.mrb[45].mxu0 }
 0x2dd   : > { %v912_v62 = vadd.f32 %v1388_v51, %v911_v49  ;;  %v1630_v63 = vpop.f32.mrb[46].mxu0 }
 0x2de   : > { %v923_v0 = vadd.f32 %v1630_v63, %v1388_v51  ;;  %v914_v1 = vpop.f32.mrb[47].mxu0  ;;  %v940_v3 = vmax.f32 %v920_v61, 0.0 }
 0x2df   : > { %v915_v2 = vadd.f32 %v1388_v51, %v914_v1  ;;  %v938_v5 = vmax.f32 %v912_v62, 0.0 }
 0x2e0   : > { %v941_v4 = vmax.f32 %v923_v0, 0.0 }
 0x2e1   : > { %v939_v6 = vmax.f32 %v915_v2, 0.0 }
 0x2e2   : > { %v949_v7 = vpack.c.bf16 %v941_v4, %v940_v3 }
 0x2e3   : > { %v948_v8 = vpack.c.bf16 %v939_v6, %v938_v5 }
 0x2e5   : > { %1659 = vmatprep.mubr.bf16.mxu1 %v948_v8 }
 0x2e6   : > { %1660 = vmatmul.mubr.bf16.gmra.mrb[40].mxu1 %v949_v7 }
 0x389   : > { %v1649_v10 = vpop.f32.mrb[48].mxu0 }
 0x38a   : > { %v1064_v11 = vadd.f32 %v1649_v10, %v2074_v9  ;;  %v1055_v12 = vpop.f32.mrb[49].mxu0 }
 0x38b   : > { %v1056_v13 = vadd.f32 %v2074_v9, %v1055_v12  ;;  %v1650_v14 = vpop.f32.mrb[50].mxu0 }
 0x38c   : > { %v1408_v15 = vmul.f32 -1.442695, %v1064_v11  ;;  %v1067_v51 = vadd.f32 %v1650_v14, %v2074_v9  ;;  %v1058_v16 = vpop.f32.mrb[51].mxu0 }
 0x38d   : > { %v1406_v17 = vmul.f32 -1.442695, %v1056_v13  ;;  %v1059_v18 = vadd.f32 %v2074_v9, %v1058_v16 }
 0x38e   : > { %1726 = vpow2.f32 %v1408_v15  ;;  %v1409_v19 = vmul.f32 -1.442695, %v1067_v51 }
 0x38f   : > { %1728 = vpow2.f32 %v1406_v17  ;;  %v1407_v20 = vmul.f32 -1.442695, %v1059_v18 }
 0x390   : > { %1730 = vpow2.f32 %v1409_v19 }
 0x391   : > { %1732 = vpow2.f32 %v1407_v20 }
 0x398   : > { %v1727_v21 = vpop.eup %1726 }
 0x399   : > { %v1729_v22 = vpop.eup %1728  ;;  %v1168_v23 = vadd.f32 1.0, %v1727_v21  ;;  %v1653_v24 = vpop.f32.mrb[32].mxu1 }
 0x39a   : > { %v1731_v25 = vpop.eup %1730  ;;  %v1166_v26 = vadd.f32 1.0, %v1729_v22  ;;  %v1080_v27 = vadd.f32 %v1653_v24, %v2074_v9  ;;  %v1071_v28 = vpop.f32.mrb[33].mxu1 }
 0x39b   : > { %v1733_v29 = vpop.eup %1732  ;;  %1734 = vrcp.f32 %v1168_v23  ;;  %v1169_v30 = vadd.f32 1.0, %v1731_v25  ;;  %v1072_v31 = vadd.f32 %v2074_v9, %v1071_v28  ;;  %v1654_v32 = vpop.f32.mrb[34].mxu1 }
 0x39c   : > { %1736 = vrcp.f32 %v1166_v26  ;;  %v1167_v33 = vadd.f32 1.0, %v1733_v29  ;;  %v1412_v34 = vmul.f32 -1.442695, %v1080_v27  ;;  %v1083_v35 = vadd.f32 %v1654_v32, %v2074_v9  ;;  %v1074_v36 = vpop.f32.mrb[35].mxu1 }
 0x39d   : > { %1738 = vrcp.f32 %v1169_v30  ;;  %v1410_v37 = vmul.f32 -1.442695, %v1072_v31  ;;  %v1075_v38 = vadd.f32 %v2074_v9, %v1074_v36 }
 0x39e   : > { %1740 = vrcp.f32 %v1167_v33  ;;  %v1413_v39 = vmul.f32 -1.442695, %v1083_v35 }
 0x39f   : > { %1742 = vpow2.f32 %v1412_v34  ;;  %v1411_v40 = vmul.f32 -1.442695, %v1075_v38 }
 0x3a0   : > { %1744 = vpow2.f32 %v1410_v37 }
 0x3a1   : > { %1746 = vpow2.f32 %v1413_v39 }
 0x3a2   : > { %1748 = vpow2.f32 %v1411_v40 }
 0x3a5   : > { %v1735_v41 = vpop.eup %1734 }
 0x3a6   : > { %v1737_v53 = vpop.eup %1736 }
 0x3a7   : > { %v1739_v54 = vpop.eup %1738 }
 0x3a8   : > { %v1741_v42 = vpop.eup %1740  ;;  %v1464_v43 = vpack.c.bf16 %v1739_v54, %v1735_v41 }
 0x3a9   : > { %v1743_v44 = vpop.eup %1742  ;;  %v1459_v45 = vpack.c.bf16 %v1741_v42, %v1737_v53  ;;  %v1657_v46 = vpop.f32.mrb[36].mxu1 }
 0x3aa   : > { %v1745_v47 = vpop.eup %1744  ;;  %1496 = vst [vmem:[%s2088_s22 + $0x8] sm:$0xff] %v1464_v43   ;;  %v1172_v50 = vadd.f32 1.0, %v1743_v44  ;;  %v1096_v48 = vadd.f32 %v1657_v46, %v2074_v9  ;;  %v1087_v52 = vpop.f32.mrb[37].mxu1 }
 0x3ab   : > { %v1747_v55 = vpop.eup %1746  ;;  %1460 = vst [vmem:[%s2088_s22] sm:$0xff] %v1459_v45   ;;  %v1170_v56 = vadd.f32 1.0, %v1745_v47  ;;  %v1088_v57 = vadd.f32 %v2074_v9, %v1087_v52  ;;  %v1658_v58 = vpop.f32.mrb[38].mxu1 }
 0x3ac   : > { %v1749_v59 = vpop.eup %1748  ;;  %1750 = vrcp.f32 %v1172_v50  ;;  %v1173_v60 = vadd.f32 1.0, %v1747_v55  ;;  %v1416_v61 = vmul.f32 -1.442695, %v1096_v48  ;;  %v1099_v49 = vadd.f32 %v1658_v58, %v2074_v9  ;;  %v1090_v62 = vpop.f32.mrb[39].mxu1 }
 0x3ad   : > { %1752 = vrcp.f32 %v1170_v56  ;;  %v1171_v63 = vadd.f32 1.0, %v1749_v59  ;;  %v1414_v0 = vmul.f32 -1.442695, %v1088_v57  ;;  %v1091_v1 = vadd.f32 %v2074_v9, %v1090_v62 }
 0x3ae   : > { %1754 = vrcp.f32 %v1173_v60  ;;  %v1417_v2 = vmul.f32 -1.442695, %v1099_v49 }
 0x3af   : > { %1756 = vrcp.f32 %v1171_v63  ;;  %v1415_v3 = vmul.f32 -1.442695, %v1091_v1 }
 0x3b0   : > { %1758 = vpow2.f32 %v1416_v61 }
 0x3b1   : > { %1760 = vpow2.f32 %v1414_v0 }
 0x3b2   : > { %1762 = vpow2.f32 %v1417_v2 }
 0x3b3   : > { %1764 = vpow2.f32 %v1415_v3 }
 0x3b6   : > { %v1751_v4 = vpop.eup %1750 }
 0x3b7   : > { %v1753_v5 = vpop.eup %1752 }
 0x3b8   : > { %v1755_v6 = vpop.eup %1754 }
 0x3b9   : > { %v1757_v7 = vpop.eup %1756  ;;  %v1474_v8 = vpack.c.bf16 %v1755_v6, %v1751_v4  ;;  %v1661_v10 = vpop.f32.mrb[40].mxu1 }
 0x3ba   : > { %v1759_v11 = vpop.eup %1758  ;;  %v1469_v12 = vpack.c.bf16 %v1757_v7, %v1753_v5  ;;  %v1112_v13 = vadd.f32 %v1661_v10, %v2074_v9  ;;  %v1103_v14 = vpop.f32.mrb[41].mxu1 }
 0x3bb   : > { %v1761_v15 = vpop.eup %1760  ;;  %1498 = vst [vmem:[%s2088_s22 + $0x18] sm:$0xff] %v1474_v8   ;;  %v1176_v51 = vadd.f32 1.0, %v1759_v11  ;;  %v1104_v16 = vadd.f32 %v2074_v9, %v1103_v14  ;;  %v1662_v17 = vpop.f32.mrb[42].mxu1 }
 0x3bc   : > { %v1763_v18 = vpop.eup %1762  ;;  %1497 = vst [vmem:[%s2088_s22 + $0x10] sm:$0xff] %v1469_v12   ;;  %v1174_v19 = vadd.f32 1.0, %v1761_v15  ;;  %v1115_v20 = vadd.f32 %v1662_v17, %v2074_v9  ;;  %v1106_v21 = vpop.f32.mrb[43].mxu1  ;;  %v1420_v24 = vmul.f32 -1.442695, %v1112_v13 }
 0x3bd   : > { %v1765_v22 = vpop.eup %1764  ;;  %1766 = vrcp.f32 %v1176_v51  ;;  %v1177_v23 = vadd.f32 1.0, %v1763_v18  ;;  %v1107_v25 = vadd.f32 %v2074_v9, %v1106_v21  ;;  %v1418_v27 = vmul.f32 -1.442695, %v1104_v16 }
 0x3be   : > { %1768 = vrcp.f32 %v1174_v19  ;;  %v1175_v26 = vadd.f32 1.0, %v1765_v22  ;;  %v1421_v28 = vmul.f32 -1.442695, %v1115_v20 }
 0x3bf   : > { %1770 = vrcp.f32 %v1177_v23  ;;  %v1419_v29 = vmul.f32 -1.442695, %v1107_v25 }
 0x3c0   : > { %1772 = vrcp.f32 %v1175_v26 }
 0x3c1   : > { %1774 = vpow2.f32 %v1420_v24 }
 0x3c2   : > { %1776 = vpow2.f32 %v1418_v27 }
 0x3c3   : > { %1778 = vpow2.f32 %v1421_v28 }
 0x3c4   : > { %1780 = vpow2.f32 %v1419_v29 }
 0x3c7   : > { %v1767_v30 = vpop.eup %1766 }
 0x3c8   : > { %v1769_v31 = vpop.eup %1768 }
 0x3c9   : > { %v1771_v32 = vpop.eup %1770 }
 0x3ca   : > { %v1773_v33 = vpop.eup %1772  ;;  %v1484_v34 = vpack.c.bf16 %v1771_v32, %v1767_v30 }
 0x3cb   : > { %v1775_v35 = vpop.eup %1774  ;;  %v1479_v9 = vpack.c.bf16 %v1773_v33, %v1769_v31 }
 0x3cc   : > { %v1777_v36 = vpop.eup %1776  ;;  %1500 = vst [vmem:[%s2088_s22 + $0x28] sm:$0xff] %v1484_v34   ;;  %v1180_v37 = vadd.f32 1.0, %v1775_v35 }
 0x3cd   : > { %v1779_v38 = vpop.eup %1778  ;;  %1499 = vst [vmem:[%s2088_s22 + $0x20] sm:$0xff] %v1479_v9   ;;  %v1178_v39 = vadd.f32 1.0, %v1777_v36 }
 0x3ce   : > { %v1781_v40 = vpop.eup %1780  ;;  %1782 = vrcp.f32 %v1180_v37  ;;  %v1181_v41 = vadd.f32 1.0, %v1779_v38 }
 0x3cf   : > { %1784 = vrcp.f32 %v1178_v39  ;;  %v1179_v53 = vadd.f32 1.0, %v1781_v40 }
 0x3d0   : > { %1786 = vrcp.f32 %v1181_v41 }
 0x3d1   : > { %1788 = vrcp.f32 %v1179_v53 }
 0x3d8   : > { %v1783_v54 = vpop.eup %1782 }
 0x3d9   : > { %v1785_v42 = vpop.eup %1784 }
 0x3da   : > { %v1787_v43 = vpop.eup %1786 }
 0x3db   : > { %v1789_v44 = vpop.eup %1788  ;;  %v1494_v45 = vpack.c.bf16 %v1787_v43, %v1783_v54 }
 0x3dc   : > { %v1489_v46 = vpack.c.bf16 %v1789_v44, %v1785_v42 }
 0x3dd   : > { %1502 = vst [vmem:[%s2088_s22 + $0x38] sm:$0xff] %v1494_v45  }
 0x3de   : > { %1501 = vst [vmem:[%s2088_s22 + $0x30] sm:$0xff] %v1489_v46  }
 0x3df PF: > { %s16_s21 = sadd.s32 1, %s1796_s21  }
 0x3e0   : > { %p13_p4 = scmp.ge.s32.totalorder %s16_s21, 4  }
 0x3e2   :  { %15 = sbr.rel (!%p13_p4) target bundleno = 1 (0x1), region = 74 }

</bundles_post_ra>
